<compile_context>
chip_gen: v6e
topology: v6e:2x2x1
jax: 0.10.0
libtpu: 0.0.40
codegen_flags: <defaults>
</compile_context>

<pallas_src>
import math

import jax
import jax.numpy as jnp
from jax.experimental import pallas as pl
from jax.experimental.pallas import tpu as pltpu

_HALF_LOG_2PI = 0.5 * math.log(2.0 * math.pi)
_LANES = 128


def _neg_log_prob_kernel(mean_ref, inv_half_var_ref, bias_ref, x_ref, o_ref):
    # mean_ref        : SMEM (1,)            scalar parameter
    # inv_half_var_ref: VMEM (1, 128)        0.5 / scale^2   (lane pattern)
    # bias_ref        : VMEM (1, 128)        log(scale) + 0.5*log(2*pi)
    # x_ref, o_ref    : VMEM (TILE_ROWS, 128)
    diff = x_ref[...] - mean_ref[0]
    o_ref[...] = diff * diff * inv_half_var_ref[...] + bias_ref[...]


def gaussian_neg_log_prob(x, mean, scale, tile_rows=8192):
    """x: (N, C) f32, mean: (1,) f32, scale: (C,) f32 -> (N, C) f32."""
    n, c = x.shape
    assert _LANES % c == 0, "C must divide 128 for the lane-dense repack"

    # Fold scale into broadcast constants on the tiny (C,) vector, replicated
    # across the 128 lanes in the same order as the row-major flatten of x.
    scale_lane = jnp.tile(scale.astype(jnp.float32), _LANES // c).reshape(1, _LANES)
    inv_half_var = 0.5 / (scale_lane * scale_lane)           # inf where scale==0
    bias = jnp.log(scale_lane) + _HALF_LOG_2PI                # -inf where scale==0

    # Lane-dense repack: free, contiguous reshape (no transpose).
    flat = x.astype(jnp.float32).reshape(-1)
    total = flat.shape[0]
    rows = pl.cdiv(total, _LANES)
    rows8 = ((rows + 7) // 8) * 8                             # sublane multiple

    # Pad only up to the next (8,128) boundary: < 4 KiB worst case, and zero
    # cost (no extra HBM pass) when total is already a multiple of 1024.
    pad = rows8 * _LANES - total
    if pad:
        flat = jnp.concatenate([flat, jnp.zeros((pad,), jnp.float32)])
    x2d = flat.reshape(rows8, _LANES)

    # Tile sizing: multiple of 8 sublanes, capped to the array, and split so
    # the grid has >= 2 steps whenever possible (keeps both v7x TCs busy).
    tile_rows = max(8, (min(tile_rows, rows8) // 8) * 8)
    if rows8 >= 16 and tile_rows >= rows8:
        tile_rows = max(8, ((rows8 // 2 + 7) // 8) * 8)

    grid = (pl.cdiv(rows8, tile_rows),)

    out2d = pl.pallas_call(
        _neg_log_prob_kernel,
        out_shape=jax.ShapeDtypeStruct((rows8, _LANES), jnp.float32),
        grid=grid,
        in_specs=[
            pl.BlockSpec(memory_space=pltpu.MemorySpace.SMEM),        # mean
            pl.BlockSpec((1, _LANES), lambda i: (0, 0)),              # inv_half_var
            pl.BlockSpec((1, _LANES), lambda i: (0, 0)),              # bias
            pl.BlockSpec((tile_rows, _LANES), lambda i: (i, 0)),      # x tile
        ],
        out_specs=pl.BlockSpec((tile_rows, _LANES), lambda i: (i, 0)),
        compiler_params=pltpu.CompilerParams(
            dimension_semantics=("parallel",),
            vmem_limit_bytes=48 << 20,
        ),
    )(mean.astype(jnp.float32), inv_half_var, bias, x2d)

    if pad:
        return out2d.reshape(-1)[:total].reshape(n, c)
    return out2d.reshape(n, c)


def _reference(x, mean, scale):
    return 0.5 * (x - mean[0]) ** 2 / (scale ** 2) + jnp.log(scale) + _HALF_LOG_2PI


if __name__ == "__main__":
    key = jax.random.PRNGKey(0)

    # Deterministic "parameters" from the module's __init__.
    mean = jnp.zeros((1,), dtype=jnp.float32)             # nn.Parameter(zeros(1))
    scale = jnp.array([1.0, 0.0], dtype=jnp.float32)      # torch.tensor([1, 0])

    # Small input consistent with forward: broadcasts against scale of shape (2,).
    x = jax.random.normal(key, (512, 2), dtype=jnp.float32)

    out = gaussian_neg_log_prob(x, mean, scale)
    out = jax.block_until_ready(out)

    ref = _reference(x, mean, scale)
    valid = scale > 0
    assert bool(
        jnp.allclose(out[:, valid], ref[:, valid], rtol=1e-6, atol=1e-6)
    ), "mismatch on finite (scale>0) column"
    # PyTorch gives nan on the scale==0 column (inf + -inf); check non-finite.
    assert bool(jnp.all(~jnp.isfinite(out[:, ~valid]))), "scale==0 column must be non-finite"

    # Exercise the multi-step pipelined grid with a small tile override.
    x2 = jax.random.normal(jax.random.PRNGKey(1), (2048, 2), dtype=jnp.float32)
    out2 = jax.block_until_ready(gaussian_neg_log_prob(x2, mean, scale, tile_rows=8))
    ref2 = _reference(x2, mean, scale)
    assert bool(
        jnp.allclose(out2[:, valid], ref2[:, valid], rtol=1e-6, atol=1e-6)
    ), "mismatch on finite column (multi-tile grid)"

    # Exercise the unaligned / padded path (total not a multiple of 1024).
    x3 = jax.random.normal(jax.random.PRNGKey(2), (300, 2), dtype=jnp.float32)
    out3 = jax.block_until_ready(gaussian_neg_log_prob(x3, mean, scale))
    ref3 = _reference(x3, mean, scale)
    assert bool(
        jnp.allclose(out3[:, valid], ref3[:, valid], rtol=1e-6, atol=1e-6)
    ), "mismatch on finite column (padded path)"

    print("KERNEL_OK")
</pallas_src>

<mosaic_0001>
module attributes {stable_mosaic.version = 11 : i64} {
  func.func @_neg_log_prob_kernel(%arg0: i32, %arg1: memref<1xf32, #tpu.memory_space<smem>>, %arg2: memref<1x128xf32, #tpu.memory_space<vmem>>, %arg3: memref<1x128xf32, #tpu.memory_space<vmem>>, %arg4: memref<8x128xf32, #tpu.memory_space<vmem>>, %arg5: memref<8x128xf32, #tpu.memory_space<vmem>>) attributes {dimension_semantics = [#tpu.dimension_semantics<parallel>], iteration_bounds = array<i64: 1>, scalar_prefetch = 0 : i64, scratch_operands = 0 : i64, tpu.core_type = #tpu.core_type<tc>, window_params = [{transform_indices = @transform_0, window_bounds = array<i64: 1>}, {pipeline_mode = #tpu.pipeline_mode<synchronous>, transform_indices = @transform_1, window_bounds = array<i64: 1, 128>}, {pipeline_mode = #tpu.pipeline_mode<synchronous>, transform_indices = @transform_2, window_bounds = array<i64: 1, 128>}, {transform_indices = @transform_3, window_bounds = array<i64: 8, 128>}, {transform_indices = @transform_4, window_bounds = array<i64: 8, 128>}]} {
    %c0 = arith.constant 0 : index
    %c0_0 = arith.constant 0 : index
    %0 = vector.load %arg4[%c0, %c0_0] : memref<8x128xf32, #tpu.memory_space<vmem>>, vector<8x128xf32>
    %c0_1 = arith.constant 0 : index
    %1 = memref.load %arg1[%c0_1] : memref<1xf32, #tpu.memory_space<smem>>
    %2 = vector.broadcast %1 : f32 to vector<8x128xf32>
    %3 = arith.subf %0, %2 : vector<8x128xf32>
    %4 = arith.mulf %3, %3 : vector<8x128xf32>
    %c0_2 = arith.constant 0 : index
    %c0_3 = arith.constant 0 : index
    %5 = vector.load %arg2[%c0_2, %c0_3] : memref<1x128xf32, #tpu.memory_space<vmem>>, vector<1x128xf32>
    %6 = vector.broadcast %5 : vector<1x128xf32> to vector<8x128xf32>
    %7 = arith.mulf %4, %6 : vector<8x128xf32>
    %c0_4 = arith.constant 0 : index
    %c0_5 = arith.constant 0 : index
    %8 = vector.load %arg3[%c0_4, %c0_5] : memref<1x128xf32, #tpu.memory_space<vmem>>, vector<1x128xf32>
    %9 = vector.broadcast %8 : vector<1x128xf32> to vector<8x128xf32>
    %10 = arith.addf %7, %9 : vector<8x128xf32>
    %c0_6 = arith.constant 0 : index
    %c0_7 = arith.constant 0 : index
    %11 = vector.load %arg5[%c0_6, %c0_7] : memref<8x128xf32, #tpu.memory_space<vmem>>, vector<8x128xf32>
    tpu.vector_store %arg5[%c0_6, %c0_7], %10 {strides = array<i32>} : memref<8x128xf32, #tpu.memory_space<vmem>>, vector<8x128xf32>,
    return
  }
  func.func @transform_0(%arg0: i32) -> i32 {
    %c0_i32 = arith.constant 0 : i32
    %c0_i32_0 = arith.constant 0 : i32
    return %c0_i32 : i32
  }
  func.func @transform_1(%arg0: i32) -> (i32, i32) {
    %c0_i32 = arith.constant 0 : i32
    %c0_i32_0 = arith.constant 0 : i32
    %c0_i32_1 = arith.constant 0 : i32
    return %c0_i32, %c0_i32_0 : i32, i32
  }
  func.func @transform_2(%arg0: i32) -> (i32, i32) {
    %c0_i32 = arith.constant 0 : i32
    %c0_i32_0 = arith.constant 0 : i32
    %c0_i32_1 = arith.constant 0 : i32
    return %c0_i32, %c0_i32_0 : i32, i32
  }
  func.func @transform_3(%arg0: i32) -> (i32, i32) {
    %c0_i32 = arith.constant 0 : i32
    %c0_i32_0 = arith.constant 0 : i32
    return %arg0, %c0_i32 : i32, i32
  }
  func.func @transform_4(%arg0: i32) -> (i32, i32) {
    %c0_i32 = arith.constant 0 : i32
    %c0_i32_0 = arith.constant 0 : i32
    return %arg0, %c0_i32 : i32, i32
  }
}

</mosaic_0001>

<bundles_post_ra>
// kernel: tpu_custom_call.1
= control target key start
LH: loop header
LB: loop body
LE: loop exit
PB: predicated region body
PF: predicated region fallthrough
CT: control target
= control target key end

     0   :  { %10 = vsyncpa [#allocation4], 0  ;;  %s158_s0 = inlined_call_operand.<no memory space> [shape: f32[1], index: 0, kind: input, shape index: {}]   ;;  %s159_s1 = inlined_call_operand.vmem [shape: f32[1,128], index: 1, kind: input, shape index: {}]   ;;  %s160_s2 = inlined_call_operand.vmem [shape: f32[1,128], index: 2, kind: input, shape index: {}]   ;;  %s161_s3 = inlined_call_operand.hbm [shape: f32[8,128], index: 3, kind: input, shape index: {}]   ;;  %s162_s4 = inlined_call_operand.hbm [shape: f32[8,128], index: 4, kind: output, shape index: {}]  }
   0x1   :  { %11 = vsyncpa [#allocation5], 0  ;;  %s116_s15 = smov [#allocation3]  }
   0x2   :  { %s24_s16 = sshll.u32 %s116_s15, 4  ;;  %s25_s16 = int_to_ptr.vmem [resolvable:$true] %s24_s16 }
   0x3   :  { %s80_s17 = scalar_lea.vmem %s25_s16, 128  ;;  %p85_p1 = scmp.lt.s32.totalorder %s25_s16, %s25_s16 }
   0x4   :  { %p81_p0 = scmp.ne.s32.totalorder %s25_s16, %s80_s17  ;;  %p86_p2 = scmp.lt.s32.totalorder %s80_s17, %s80_s17 }
   0x6   :  { %p87_p3 = por %p86_p2, %p85_p1 }
   0x8   :  { %p88_p4 = pnand %p87_p3, %p81_p0 }
   0xa   :  { %91 = shalt.err (!%p88_p4)
}
   0xb   :  { %27 = dma.hbm_to_vmem [thread:$0]  %s161_s3, 128, %s25_s16, [#allocation4]  }
   0xc   :  { %112 = dma.done.wait [#allocation4], 128  }
   0xd   :  { %113 = vsyncadd [#allocation4], 4294967168  ;;  %v33_v0 = vstv %s158_s0  ;;  %v31_v1 = vld [vmem:[#allocation3] sm:$0xff]  ;;  %s117_s26 = smov [#allocation6]  }
   0xe   :  { %v34_v2 = vsub.f32 %v31_v1, %v33_v0  ;;  %v68_v3 = vld [vmem:[%s159_s1] ss:$0 sm:$0xff]  ;;  %s59_s27 = sshll.u32 %s117_s26, 4  ;;  %s60_s27 = int_to_ptr.vmem [resolvable:$true] %s59_s27 }
   0xf   :  { %v69_v5 = vld [vmem:[%s160_s2] ss:$0 sm:$0xff]  ;;  %s92_s3 = scalar_lea.vmem %s60_s27, 128  ;;  %p97_p6 = scmp.lt.s32.totalorder %s60_s27, %s60_s27 }
  0x10   :  { %v35_v4 = vmul.f32 %v34_v2, %v34_v2  ;;  %p93_p5 = scmp.ne.s32.totalorder %s60_s27, %s92_s3  ;;  %p98_p7 = scmp.lt.s32.totalorder %s92_s3, %s92_s3 }
  0x12   :  { %v43_v6 = vmul.f32 %v68_v3, %v35_v4  ;;  %p99_p8 = por %p98_p7, %p97_p6 }
  0x14   :  { %v51_v7 = vadd.f32 %v69_v5, %v43_v6  ;;  %p100_p9 = pnand %p99_p8, %p93_p5 }
  0x16   :  { %52 = vst [vmem:[#allocation6] sm:$0xff] %v51_v7 }
  0x17   :  { %103 = shalt.err (!%p100_p9)
}
  0x18   :  { %62 = dma.vmem_to_hbm [thread:$0]  %s60_s27, 128, %s162_s4, [#allocation5]  }
  0x19   :  { %114 = dma.done.wait [#allocation5], 128  }
  0x1a   :  { %115 = vsyncadd [#allocation5], 4294967168 }
  0x1b   :  { %66 = vsyncpa [#allocation4], 1 }
  0x1c   :  { %67 = vsyncpa [#allocation5], 1 }

</bundles_post_ra>
